<compile_context>
chip_gen: v7x
topology: tpu7x:2x2x1
jax: 0.10.0
libtpu: 0.0.40
codegen_flags: <defaults>
</compile_context>

<pallas_src>
import math

import jax
import jax.numpy as jnp
from jax.experimental import pallas as pl
from jax.experimental.pallas import tpu as pltpu


def _make_kernel(use_tanh):
    """Fused activation -> duplicate -> tanh kernel.

    x_ref: (bt, F)     flattened input row-tile (VMEM)
    o_ref: (bt, 2, F)  output row-tile; copy k=0 and k=1 hold the same data
                       (wrapper reshapes to (bt, 2*F), i.e. cat((r, r), dim=1))
    """
    def kernel(x_ref, o_ref):
        x = x_ref[...]
        # First activation: branch is shape-static, resolved at trace time.
        y = jnp.tanh(x) if use_tanh else jnp.maximum(x, 0.0)
        # tanh(cat(y, y)) == cat(tanh(y), tanh(y)): compute once, store twice.
        r = jnp.tanh(y)
        # Both stores are at lane offset 0 (duplicate axis is NOT the lane axis),
        # so no cross-lane relayout / masked partial store is needed.
        o_ref[:, 0, :] = r
        o_ref[:, 1, :] = r
    return kernel


def _choose_row_tile(b, feat, itemsize):
    """Largest row tile that fits a conservative VMEM budget.

    Per row through VMEM: input (feat) + output (2*feat), double-buffered.
    Budget is kept well under v7x's 32 MiB scoped-VMEM default (64 MiB phys).
    """
    budget = 8 * 1024 * 1024
    per_row = 2 * (feat + 2 * feat) * itemsize
    bt = budget // max(per_row, 1)
    if bt >= b:
        return b
    return max(8, (bt // 8) * 8)


def model_forward(x, *, use_pallas=None):
    """x: (B, D1, D2, ...) float32 -> (B, 2 * prod(D*)) float32."""
    b = x.shape[0]
    feat = math.prod(x.shape[1:]) if len(x.shape) > 1 else 1
    x_flat = x.reshape(b, feat)  # same semantics as torch .view(B, -1)

    # Shape-dependent branch of the PyTorch model: shapes are static in JAX,
    # so the branch is decided here (tanh for (2,4)/(2,8), relu otherwise).
    use_tanh = (b, feat) == (2, 4) or (b, feat) == (2, 8)

    if use_pallas is None:
        # Below a few vregs of work the pallas_call is pure launch/DMA overhead
        # and blocks XLA fusion -> use plain jnp and let XLA fuse it.
        use_pallas = b * feat >= 8 * 128

    if not use_pallas:
        y = jnp.tanh(x_flat) if use_tanh else jnp.maximum(x_flat, 0.0)
        r = jnp.tanh(y)
        return jnp.concatenate([r, r], axis=1)

    bt = _choose_row_tile(b, feat, x_flat.dtype.itemsize)
    grid = (pl.cdiv(b, bt),)

    out3 = pl.pallas_call(
        _make_kernel(use_tanh),
        out_shape=jax.ShapeDtypeStruct((b, 2, feat), x_flat.dtype),
        grid=grid,
        in_specs=[pl.BlockSpec((bt, feat), lambda i: (i, 0))],
        out_specs=pl.BlockSpec((bt, 2, feat), lambda i: (i, 0, 0)),
        compiler_params=pltpu.CompilerParams(
            dimension_semantics=("parallel",)),
    )(x_flat)

    # Free contiguous reshape: (B, 2, F) -> (B, 2*F) == cat((r, r), dim=1).
    return out3.reshape(b, 2 * feat)


if __name__ == "__main__":
    key = jax.random.PRNGKey(0)
    x = jax.random.normal(key, (2, 2, 2), dtype=jnp.float32)

    # Force the Pallas path so the kernel itself is exercised on TPU.
    out = model_forward(x, use_pallas=True)
    out = jax.block_until_ready(out)

    # Reference check in plain JAX (mirrors the PyTorch forward exactly).
    y = x.reshape(2, -1)
    y = jnp.tanh(y)  # (2, 4) -> tanh branch
    ref = jnp.tanh(jnp.concatenate([y, y], axis=1))
    assert out.shape == (2, 8)
    assert jnp.allclose(out, ref, rtol=1e-5, atol=1e-6), "mismatch vs reference"

    # Default wrapper path (tiny shape -> fused plain-jnp fallback) must agree too.
    out_default = jax.block_until_ready(model_forward(x))
    assert jnp.allclose(out_default, ref, rtol=1e-5, atol=1e-6)

    print("KERNEL_OK")
</pallas_src>

<mosaic_0001>
module attributes {stable_mosaic.version = 11 : i64} {
  func.func @kernel(%arg0: i32, %arg1: memref<2x4xf32, #tpu.memory_space<vmem>>, %arg2: memref<2x2x4xf32, #tpu.memory_space<vmem>>) attributes {dimension_semantics = [#tpu.dimension_semantics<parallel>], iteration_bounds = array<i64: 1>, scalar_prefetch = 0 : i64, scratch_operands = 0 : i64, tpu.core_type = #tpu.core_type<tc>, window_params = [{transform_indices = @transform_0, window_bounds = array<i64: 2, 4>}, {transform_indices = @transform_1, window_bounds = array<i64: 2, 2, 4>}]} {
    %c0 = arith.constant 0 : index
    %c0_0 = arith.constant 0 : index
    %0 = vector.load %arg1[%c0, %c0_0] : memref<2x4xf32, #tpu.memory_space<vmem>>, vector<2x4xf32>
    %1 = math.tanh %0 : vector<2x4xf32>
    %2 = math.tanh %1 : vector<2x4xf32>
    %c0_1 = arith.constant 0 : index
    %c0_2 = arith.constant 0 : index
    %c0_3 = arith.constant 0 : index
    %3 = vector.load %arg2[%c0_1, %c0_2, %c0_3] : memref<2x2x4xf32, #tpu.memory_space<vmem>>, vector<2x1x4xf32>
    %4 = vector.shape_cast %3 : vector<2x1x4xf32> to vector<2x4xf32>
    %5 = vector.shape_cast %2 : vector<2x4xf32> to vector<2x1x4xf32>
    tpu.vector_store %arg2[%c0_1, %c0_2, %c0_3], %5 {strides = array<i32>} : memref<2x2x4xf32, #tpu.memory_space<vmem>>, vector<2x1x4xf32>,
    %c0_4 = arith.constant 0 : index
    %c1 = arith.constant 1 : index
    %c0_5 = arith.constant 0 : index
    %6 = vector.load %arg2[%c0_4, %c1, %c0_5] : memref<2x2x4xf32, #tpu.memory_space<vmem>>, vector<2x1x4xf32>
    %7 = vector.shape_cast %6 : vector<2x1x4xf32> to vector<2x4xf32>
    %8 = vector.shape_cast %2 : vector<2x4xf32> to vector<2x1x4xf32>
    tpu.vector_store %arg2[%c0_4, %c1, %c0_5], %8 {strides = array<i32>} : memref<2x2x4xf32, #tpu.memory_space<vmem>>, vector<2x1x4xf32>,
    return
  }
  func.func @transform_0(%arg0: i32) -> (i32, i32) {
    %c0_i32 = arith.constant 0 : i32
    %c0_i32_0 = arith.constant 0 : i32
    return %arg0, %c0_i32 : i32, i32
  }
  func.func @transform_1(%arg0: i32) -> (i32, i32, i32) {
    %c0_i32 = arith.constant 0 : i32
    %c0_i32_0 = arith.constant 0 : i32
    %c0_i32_1 = arith.constant 0 : i32
    return %arg0, %c0_i32, %c0_i32_0 : i32, i32, i32
  }
}

</mosaic_0001>

<bundles_post_ra>
// kernel: tpu_custom_call.1
= control target key start
LH: loop header
LB: loop body
LE: loop exit
PB: predicated region body
PF: predicated region fallthrough
CT: control target
= control target key end

     0   :  { %6 = vsyncpa [#allocation3], 0  ;;  %s167_s0 = inlined_call_operand.hbm [shape: f32[2,4], index: 0, kind: input, shape index: {}]   ;;  %s168_s1 = inlined_call_operand.hbm [shape: f32[2,2,4], index: 1, kind: output, shape index: {}]  }
   0x1   :  { %7 = vsyncpa [#allocation4], 0  ;;  %s128_s6 = smov [#allocation2]   ;;  %s80_s10 = scalar_lea.hbm %s167_s0, 32 }
   0x2   :  { %s14_s7 = sshll.u32 %s128_s6, 4  ;;  %p81_p0 = scmp.ne.s32.totalorder %s167_s0, %s80_s10  ;;  %s15_s7 = int_to_ptr.vmem [resolvable:$true] %s14_s7 }
   0x3   :  { %p84_p1 = scmp.lt.u32.totalorder %s80_s10, %s167_s0 }
   0x5   :  { %p86_p2 = pnand %p84_p1, %p81_p0 }
   0x7   :  { %89 = shalt.err (!%p86_p2)
}
   0x8   :  { %s90_s15 = scalar_lea.vmem %s15_s7, 32  ;;  %p95_p4 = scmp.lt.s32.totalorder %s15_s7, %s15_s7 }
   0x9   :  { %p91_p3 = scmp.ne.s32.totalorder %s15_s7, %s90_s15  ;;  %p96_p5 = scmp.lt.s32.totalorder %s90_s15, %s90_s15 }
   0xb   :  { %p97_p6 = por %p96_p5, %p95_p4 }
   0xd   :  { %p98_p7 = pnand %p97_p6, %p91_p3 }
   0xf   :  { %101 = shalt.err (!%p98_p7)
}
  0x10   :  { %17 = dma.hbm_to_vmem [thread:$0]  %s167_s0, 32, %s15_s7, [#allocation3]  }
  0x11   :  { %124 = dma.done.wait [#allocation3], 32  }
  0x12   :  { %125 = vsyncadd [#allocation3], 4294967264  ;;  %v21_v0 = vld [vmem:[#allocation2] sm:$0x3]  ;;  %v129_v2 = vmov 1966171168   ;;  %v28_v4 = vlaneseq }
  0x13   :  { %76 = vtanh.f32 %v21_v0  ;;  %v26_v3 = vunpack.c.l.s4 %v129_v2  ;;  %vm49_vm0 = vcmask 24576   ;;  %s130_s18 = smov [#allocation5]  }
  0x14   :  { %v29_v6 = vshrl.u32 %v28_v4, 7  ;;  %s59_s19 = sshll.u32 %s130_s18, 4  ;;  %s60_s19 = int_to_ptr.vmem [resolvable:$true] %s59_s19 }
  0x15   :  { %v27_v5 = vunpack.c.0.s8 %v26_v3  ;;  %s102_s0 = scalar_lea.vmem %s60_s19, 64  ;;  %p107_p9 = scmp.lt.s32.totalorder %s60_s19, %s60_s19 }
  0x16   :  { %p103_p8 = scmp.ne.s32.totalorder %s60_s19, %s102_s0  ;;  %p108_p10 = scmp.lt.s32.totalorder %s102_s0, %s102_s0 }
  0x17   :  { %v30_v7 = vsub.s32 %v27_v5, %v29_v6 }
  0x18   :  { %p109_p11 = por %p108_p10, %p107_p9 }
  0x1a   :  { %p110_p12 = pnand %p109_p11, %p103_p8 }
  0x1d   :  { %v77_v1 = vpop.eup %76 }
  0x1e   :  { %78 = vtanh.f32 %v77_v1 }
  0x28   :  { %v79_v8 = vpop.eup %78 }
  0x29   :  { %v31_v9 = vrot.slane %v79_v8, %v30_v7 }
  0x2b   :  { %v39_v10 = vrot.slane %v31_v9, %v30_v7  ;;  %v32_v11 = vcombine.high %v31_v9, %v31_v9 }
  0x2d   :  { %50 = vst.msk [vmem:[#allocation5] sm:$0x1] %vm49_vm0, %v39_v10  ;;  %52 = vst.msk [vmem:[#allocation5 + $0x1] sm:$0x1] %vm49_vm0, %v39_v10  ;;  %v46_v12 = vrot.slane %v32_v11, %v30_v7 }
  0x2f   :  { %51 = vst.msk [vmem:[#allocation5 + $0x2] sm:$0x1] %vm49_vm0, %v46_v12  ;;  %53 = vst.msk [vmem:[#allocation5 + $0x3] sm:$0x1] %vm49_vm0, %v46_v12 }
  0x30   :  { %113 = shalt.err (!%p110_p12)
}
  0x31   :  { %s114_s22 = scalar_lea.hbm %s168_s1, 64 }
  0x32   :  { %p115_p13 = scmp.ne.s32.totalorder %s168_s1, %s114_s22  ;;  %p118_p0 = scmp.lt.u32.totalorder %s114_s22, %s168_s1 }
  0x34   :  { %p120_p1 = pnand %p118_p0, %p115_p13 }
  0x36   :  { %123 = shalt.err (!%p120_p1)
}
  0x37   :  { %s131_s27 = smov 32   ;;  %s132_s28 = smov 2  }
  0x38   :  { %65 = dma.vmem_to_hbm [thread:$0]  %s60_s19, 64, %s168_s1, [#allocation4], %s131_s27, %s131_s27, %s132_s28  }
  0x39   :  { %126 = dma.done.wait [#allocation4], 64  }
  0x3a   :  { %127 = vsyncadd [#allocation4], 4294967232 }
  0x3b   :  { %69 = vsyncpa [#allocation3], 1 }
  0x3c   :  { %70 = vsyncpa [#allocation4], 1 }

</bundles_post_ra>
